<compile_context>
chip_gen: v7x
topology: tpu7x:2x2x1
jax: 0.10.0
libtpu: 0.0.40
codegen_flags: <defaults>
</compile_context>

<pallas_src>
import functools

import jax
import jax.numpy as jnp
from jax import lax
from jax.experimental import pallas as pl
from jax.experimental.pallas import tpu as pltpu


def _cdiv(a, b):
    return (a + b - 1) // b


# ---------------------------------------------------------------------------
# Pass 1: conv-as-matmul (im2col tile @ weights) + per-channel partial sums.
# ---------------------------------------------------------------------------
def _matmul_stats_kernel(a_ref, w_ref, y_ref, part_ref):
    # a_ref:    (TM, KCp)  bf16 im2col tile (streamed, double-buffered)
    # w_ref:    (KCp, CP)  bf16 weights (same block every step -> stays resident)
    # y_ref:    (TM, CP)   f32 conv output tile
    # part_ref: (8, CP)    f32 per-tile stats: row0 = sum(y), row1 = sum(y*y)
    y = jnp.dot(a_ref[...], w_ref[...], preferred_element_type=jnp.float32)
    y_ref[...] = y

    tm = y.shape[0]
    # Per-channel partial sums on the MXU (selector-row matmuls) instead of a
    # deep cross-sublane VPU/XLU reduction: rides the already-hot MXU slot.
    rows = lax.broadcasted_iota(jnp.int32, (8, tm), 0)
    e0 = (rows == 0).astype(jnp.float32)   # picks sum(y)   into row 0
    e1 = (rows == 1).astype(jnp.float32)   # picks sum(y*y) into row 1
    part_ref[...] = (
        jnp.dot(e0, y, preferred_element_type=jnp.float32)
        + jnp.dot(e1, y * y, preferred_element_type=jnp.float32))


# ---------------------------------------------------------------------------
# Pass 2: apply batch-norm affine (precomputed per-channel scale/shift) + LReLU.
# ---------------------------------------------------------------------------
def _bn_lrelu_kernel(y_ref, scale_ref, shift_ref, o_ref, *, alpha):
    z = y_ref[...] * scale_ref[...] + shift_ref[...]
    o_ref[...] = jnp.where(z >= 0, z, alpha * z)


def conv_block3d(x_ncdhw, weight_oidhw, gamma, beta, *, stride, size,
                 alpha_lrelu=0.2, eps=1e-5, tile_m=512):
    """Forward pass of ConvBlock3d. x_ncdhw: (N, Cin, D, H, W) float32."""
    N, Cin, D, H, W = x_ncdhw.shape
    Cout = weight_oidhw.shape[0]
    K = size
    pad = (size - 1) // 2
    s = stride

    # NCDHW -> NDHWC (channels-last, lane-friendly)
    x = jnp.transpose(x_ncdhw, (0, 2, 3, 4, 1))

    # forward(): F.pad(x, (0,1,0,1,0,1)) when stride == 1 (right/bottom/back)
    extra = 1 if stride == 1 else 0
    x = jnp.pad(x, ((0, 0), (0, extra), (0, extra), (0, extra), (0, 0)))
    # Conv3d's own symmetric 'zeros' padding
    x = jnp.pad(x, ((0, 0), (pad, pad), (pad, pad), (pad, pad), (0, 0)))

    Dp, Hp, Wp = x.shape[1], x.shape[2], x.shape[3]
    Do = (Dp - K) // s + 1
    Ho = (Hp - K) // s + 1
    Wo = (Wp - K) // s + 1
    M = N * Do * Ho * Wo
    KC = K * K * K * Cin

    # Lane / MXU friendly padded sizes.
    LANE = 128
    CP = _cdiv(Cout, LANE) * LANE          # padded output channels (lane-dense)
    KCp = _cdiv(KC, LANE) * LANE           # padded contraction dim
    TM = tile_m
    Mp = _cdiv(M, TM) * TM                 # padded rows (zero rows are inert:
    num_tiles = Mp // TM                   #   no bias, so they add 0 to stats)

    # im2col (glue / data movement): tap-major, Cin-minor ordering, bf16.
    # TODO(synk): on v5e, build patches in-kernel from a VMEM-resident x tile
    # (memory_space=pl.ANY + manual DMA) to avoid the K^3 im2col HBM blow-up.
    cols = []
    for kd in range(K):
        for kh in range(K):
            for kw in range(K):
                cols.append(
                    x[:,
                      kd:kd + (Do - 1) * s + 1:s,
                      kh:kh + (Ho - 1) * s + 1:s,
                      kw:kw + (Wo - 1) * s + 1:s,
                      :])                                   # (N, Do, Ho, Wo, Cin)
    a = jnp.concatenate(cols, axis=-1).reshape(M, KC).astype(jnp.bfloat16)
    a = jnp.pad(a, ((0, Mp - M), (0, KCp - KC)))            # zero pads: inert

    # (Cout, Cin, K, K, K) -> (K^3*Cin, Cout), padded, bf16.
    w = jnp.transpose(weight_oidhw, (2, 3, 4, 1, 0)).reshape(KC, Cout)
    w = jnp.pad(w, ((0, KCp - KC), (0, CP - Cout))).astype(jnp.bfloat16)

    # ---- Pass 1: tiled conv matmul + per-tile channel sum / sum-of-squares.
    y_flat, part = pl.pallas_call(
        _matmul_stats_kernel,
        out_shape=(jax.ShapeDtypeStruct((Mp, CP), jnp.float32),
                   jax.ShapeDtypeStruct((num_tiles * 8, CP), jnp.float32)),
        grid=(num_tiles,),
        in_specs=[
            pl.BlockSpec((TM, KCp), lambda i: (i, 0)),      # streamed A tiles
            pl.BlockSpec((KCp, CP), lambda i: (0, 0)),      # resident weights
        ],
        out_specs=(
            pl.BlockSpec((TM, CP), lambda i: (i, 0)),
            pl.BlockSpec((8, CP), lambda i: (i, 0)),
        ),
        compiler_params=pltpu.CompilerParams(
            dimension_semantics=("parallel",)),             # megacore-friendly
    )(a, w)

    # ---- Tiny per-channel glue (CP values): mean / biased var -> affine.
    sums = part.reshape(num_tiles, 8, CP).sum(axis=0)
    mean = sums[0] / float(M)
    var = jnp.maximum(sums[1] / float(M) - mean * mean, 0.0)   # biased var
    gamma_p = jnp.pad(gamma.astype(jnp.float32), (0, CP - Cout),
                      constant_values=1.0)
    beta_p = jnp.pad(beta.astype(jnp.float32), (0, CP - Cout))
    scale = (gamma_p * lax.rsqrt(var + eps)).reshape(1, CP)
    shift = (beta_p - mean * scale[0]).reshape(1, CP)
    # TODO(synk): BatchNorm running_mean/running_var update (training-only side
    # effect; it does not change the forward output) is not modeled.

    # ---- Pass 2: normalize + LeakyReLU, lane-dense, tiled over M.
    out_flat = pl.pallas_call(
        functools.partial(_bn_lrelu_kernel, alpha=alpha_lrelu),
        out_shape=jax.ShapeDtypeStruct((Mp, CP), jnp.float32),
        grid=(num_tiles,),
        in_specs=[
            pl.BlockSpec((TM, CP), lambda i: (i, 0)),
            pl.BlockSpec((1, CP), lambda i: (0, 0)),
            pl.BlockSpec((1, CP), lambda i: (0, 0)),
        ],
        out_specs=pl.BlockSpec((TM, CP), lambda i: (i, 0)),
        compiler_params=pltpu.CompilerParams(
            dimension_semantics=("parallel",)),
    )(y_flat, scale, shift)

    # Un-pad and back to NCDHW.
    y = out_flat[:M, :Cout].reshape(N, Do, Ho, Wo, Cout)
    return jnp.transpose(y, (0, 4, 1, 2, 3))


def _reference(x_ncdhw, weight, gamma, beta, stride, size, alpha=0.2, eps=1e-5):
    """Pure-JAX reference matching the PyTorch forward (training-mode BN)."""
    pad = (size - 1) // 2
    x = x_ncdhw
    if stride == 1:
        x = jnp.pad(x, ((0, 0), (0, 0), (0, 1), (0, 1), (0, 1)))
    y = lax.conv_general_dilated(
        x, weight,
        window_strides=(stride,) * 3,
        padding=[(pad, pad)] * 3,
        dimension_numbers=('NCDHW', 'OIDHW', 'NCDHW'),
        precision=lax.Precision.HIGHEST)
    mean = jnp.mean(y, axis=(0, 2, 3, 4), keepdims=True)
    var = jnp.mean(jnp.square(y - mean), axis=(0, 2, 3, 4), keepdims=True)
    yhat = (y - mean) / jnp.sqrt(var + eps)
    y = yhat * gamma.reshape(1, -1, 1, 1, 1) + beta.reshape(1, -1, 1, 1, 1)
    return jnp.where(y >= 0, y, alpha * y)


if __name__ == "__main__":
    key = jax.random.PRNGKey(0)
    k1, k2, k3, k4 = jax.random.split(key, 4)

    # ConvBlock3d(in_channels=4, nfilters=8, size=3, strides=1)
    N, Cin, D, H, W = 2, 4, 8, 8, 8
    Cout, K, stride = 8, 3, 1
    alpha = 0.2

    x = jax.random.normal(k1, (N, Cin, D, H, W), jnp.float32)
    bound = 1.0 / jnp.sqrt(Cin * K * K * K)
    weight = jax.random.uniform(k2, (Cout, Cin, K, K, K), jnp.float32,
                                minval=-bound, maxval=bound)
    gamma = 1.0 + 0.1 * jax.random.normal(k3, (Cout,), jnp.float32)
    beta = 0.1 * jax.random.normal(k4, (Cout,), jnp.float32)

    out = conv_block3d(x, weight, gamma, beta, stride=stride, size=K,
                       alpha_lrelu=alpha)
    out = jax.block_until_ready(out)

    ref = _reference(x, weight, gamma, beta, stride, K, alpha=alpha)
    assert out.shape == ref.shape, (out.shape, ref.shape)
    # bf16 MXU inputs (per perf review) -> compare against the f32 reference
    # with a bf16-appropriate tolerance; accumulation and BN stats are f32.
    max_err = float(jnp.max(jnp.abs(out - ref)))
    assert jnp.allclose(out, ref, atol=3e-2, rtol=3e-2), max_err
    print("KERNEL_OK")
</pallas_src>

<mosaic_0001>
module attributes {stable_mosaic.version = 11 : i64} {
  func.func @_matmul_stats_kernel(%arg0: i32, %arg1: memref<512x128xbf16, #tpu.memory_space<vmem>>, %arg2: memref<128x128xbf16, #tpu.memory_space<vmem>>, %arg3: memref<512x128xf32, #tpu.memory_space<vmem>>, %arg4: memref<8x128xf32, #tpu.memory_space<vmem>>) attributes {dimension_semantics = [#tpu.dimension_semantics<parallel>], iteration_bounds = array<i64: 3>, scalar_prefetch = 0 : i64, scratch_operands = 0 : i64, tpu.core_type = #tpu.core_type<tc>, window_params = [{transform_indices = @transform_0, window_bounds = array<i64: 512, 128>}, {pipeline_mode = #tpu.pipeline_mode<synchronous>, transform_indices = @transform_1, window_bounds = array<i64: 128, 128>}, {transform_indices = @transform_2, window_bounds = array<i64: 512, 128>}, {transform_indices = @transform_3, window_bounds = array<i64: 8, 128>}]} {
    %c0 = arith.constant 0 : index
    %c0_0 = arith.constant 0 : index
    %0 = vector.load %arg1[%c0, %c0_0] : memref<512x128xbf16, #tpu.memory_space<vmem>>, vector<512x128xbf16>
    %c0_1 = arith.constant 0 : index
    %c0_2 = arith.constant 0 : index
    %1 = vector.load %arg2[%c0_1, %c0_2] : memref<128x128xbf16, #tpu.memory_space<vmem>>, vector<128x128xbf16>
    %cst = arith.constant dense<0.000000e+00> : vector<512x128xf32>
    %2 = tpu.matmul %0, %1, %cst {dimension_numbers = #tpu.dot_dimension_numbers<[1], [0], [0], [1], [0, 0, 1, 1], [], []>} : vector<512x128xbf16>, vector<128x128xbf16>, vector<512x128xf32> -> vector<512x128xf32>
    %c0_3 = arith.constant 0 : index
    %c0_4 = arith.constant 0 : index
    %3 = vector.load %arg3[%c0_3, %c0_4] : memref<512x128xf32, #tpu.memory_space<vmem>>, vector<512x128xf32>
    tpu.vector_store %arg3[%c0_3, %c0_4], %2 {strides = array<i32>} : memref<512x128xf32, #tpu.memory_space<vmem>>, vector<512x128xf32>,
    %4 = tpu.iota {dimensions = array<i32: 0>} : vector<8x512xi32>
    %c0_i32 = arith.constant 0 : i32
    %5 = vector.broadcast %c0_i32 : i32 to vector<8x512xi32>
    %6 = arith.cmpi eq, %4, %5 : vector<8x512xi32>
    %7 = arith.extui %6 : vector<8x512xi1> to vector<8x512xi32>
    %8 = arith.sitofp %7 : vector<8x512xi32> to vector<8x512xf32>
    %c1_i32 = arith.constant 1 : i32
    %9 = vector.broadcast %c1_i32 : i32 to vector<8x512xi32>
    %10 = arith.cmpi eq, %4, %9 : vector<8x512xi32>
    %11 = arith.extui %10 : vector<8x512xi1> to vector<8x512xi32>
    %12 = arith.sitofp %11 : vector<8x512xi32> to vector<8x512xf32>
    %cst_5 = arith.constant dense<0.000000e+00> : vector<8x128xf32>
    %13 = tpu.matmul %8, %2, %cst_5 {dimension_numbers = #tpu.dot_dimension_numbers<[1], [0], [0], [1], [0, 0, 1, 1], [], []>} : vector<8x512xf32>, vector<512x128xf32>, vector<8x128xf32> -> vector<8x128xf32>
    %14 = arith.mulf %2, %2 : vector<512x128xf32>
    %cst_6 = arith.constant dense<0.000000e+00> : vector<8x128xf32>
    %15 = tpu.matmul %12, %14, %cst_6 {dimension_numbers = #tpu.dot_dimension_numbers<[1], [0], [0], [1], [0, 0, 1, 1], [], []>} : vector<8x512xf32>, vector<512x128xf32>, vector<8x128xf32> -> vector<8x128xf32>
    %16 = arith.addf %13, %15 : vector<8x128xf32>
    %c0_7 = arith.constant 0 : index
    %c0_8 = arith.constant 0 : index
    %17 = vector.load %arg4[%c0_7, %c0_8] : memref<8x128xf32, #tpu.memory_space<vmem>>, vector<8x128xf32>
    tpu.vector_store %arg4[%c0_7, %c0_8], %16 {strides = array<i32>} : memref<8x128xf32, #tpu.memory_space<vmem>>, vector<8x128xf32>,
    return
  }
  func.func @transform_0(%arg0: i32) -> (i32, i32) {
    %c0_i32 = arith.constant 0 : i32
    %c0_i32_0 = arith.constant 0 : i32
    return %arg0, %c0_i32 : i32, i32
  }
  func.func @transform_1(%arg0: i32) -> (i32, i32) {
    %c0_i32 = arith.constant 0 : i32
    %c0_i32_0 = arith.constant 0 : i32
    %c0_i32_1 = arith.constant 0 : i32
    return %c0_i32, %c0_i32_0 : i32, i32
  }
  func.func @transform_2(%arg0: i32) -> (i32, i32) {
    %c0_i32 = arith.constant 0 : i32
    %c0_i32_0 = arith.constant 0 : i32
    return %arg0, %c0_i32 : i32, i32
  }
  func.func @transform_3(%arg0: i32) -> (i32, i32) {
    %c0_i32 = arith.constant 0 : i32
    %c0_i32_0 = arith.constant 0 : i32
    return %arg0, %c0_i32 : i32, i32
  }
}

</mosaic_0001>

<bundles_post_ra>
// kernel: tpu_custom_call.1
= control target key start
LH: loop header
LB: loop body
LE: loop exit
PB: predicated region body
PF: predicated region fallthrough
CT: control target
= control target key end

     0   :  { %9 = vsyncpa [#allocation3], 0  ;;  %s3092_s0 = inlined_call_operand.hbm [shape: bf16[1536,128], index: 0, kind: input, shape index: {}]   ;;  %s3093_s1 = inlined_call_operand.hbm [shape: bf16[128,128], index: 1, kind: input, shape index: {}]   ;;  %s3094_s2 = inlined_call_operand.hbm [shape: f32[1536,128], index: 2, kind: output, shape index: {0}]   ;;  %s3095_s3 = inlined_call_operand.hbm [shape: f32[24,128], index: 3, kind: output, shape index: {1}]  }
   0x1   :  { %11 = vsyncpa [#allocation3 + $0x1], 0 }
   0x2   :  { %12 = vsyncpa [#allocation6], 0 }
   0x3   :  { %13 = vsyncpa [#allocation4], 0 }
   0x4   :  { %15 = vsyncpa [#allocation4 + $0x1], 0 }
   0x5   :  { %16 = vsyncpa [#allocation9], 0 }
   0x6   :  { %18 = vsyncpa [#allocation9 + $0x1], 0  ;;  %s2148_s12 = smov 0   ;;  %s2150_s13 = smov 0  }
   0x7   :  { %s2152_s14 = smov 0   ;;  %s2154_s15 = smov 0  }
   0x8 LB: > { %s2169_s16 = sadd.s32 4294967295, %s2117_s15   ;;  %s1391_s17 = sadd.s32 4294967294, %s2117_s15   ;;  %s2117_s15 = sphi %s2154_s15, %s3214_s15   ;;  %s2113_s14 = sphi %s2152_s14, %s3213_s14   ;;  %s2109_s13 = sphi %s2150_s13, %s3212_s13   ;;  %s2105_s12 = sphi %s2148_s12, %s3211_s12  }
   0x9   : > { %p44_p0 = scmp.ne.s32.totalorder %s2109_s13, %s2105_s12  ;;  %p3096_p1 = scmp.eq.s32.totalorder %s2169_s16, 0 }
   0xa   : > { %p95_p3 = scmp.eq.s32.totalorder %s1391_s17, 2  ;;  %p1392_p5 = scmp.ge.s32.totalorder %s2117_s15, 1 }
   0xb   : > { %p2178_p4 = por %p3096_p1, %p44_p0  ;;  %p128_p7 = scmp.lt.s32.totalorder %s2117_s15, 4 }
   0xc   : > { %p2183_p6 = por %p95_p3, %p44_p0  ;;  %s2119_s21 = smov [#allocation5]  }
   0xd   : > { %s3121_s18 = scalar_select %p2178_p4, 1, 0 }
   0xe   : > { %s3122_s19 = scalar_select %p2183_p6, 1, 0 }
   0xf   : > { %p2188_p8 = pnand %p1392_p5, %p128_p7  ;;  %s140_s22 = sshll.u32 %s2119_s21, 4  ;;  %s141_s22 = int_to_ptr.vmem [resolvable:$true] %s140_s22 }
  0x10   : > { %s2201_s24 = sadd.s32 1, %s2117_s15   ;;  %s31_s25 = sadd.s32 1, %s2113_s14 }
  0x11   : > { %s3123_s20 = scalar_select %p2188_p8, 1, 0 }
  0x12   : > { %p1860_p9 = pneg %p2188_p8  ;;  %s28_s26 = ssub.s32 %s2117_s15, %s2201_s24 }
  0x13   : > { %s1957_s29 = scalar_lea.hbm %s3093_s1, 1024 }
  0x14   : > { %p2196_p10 = pnand %p1860_p9, %p3096_p1  ;;  %p1958_p11 = scmp.ne.s32.totalorder %s3093_s1, %s1957_s29 }
  0x15   : > { %p1964_p3 = scmp.lt.u32.totalorder %s1957_s29, %s3093_s1 }
  0x16   : > { %p1959_p12 = pneg %p2196_p10 }
  0x18   : > { %p1960_p13 = pnand %p1959_p12, %p1958_p11 }
  0x1a   : > { %p1961_p0 = pneg %p1960_p13 }
  0x1c   : > { %p1966_p5 = pnand %p1964_p3, %p1961_p0 }
  0x1e   : > { %1969 = shalt.err (!%p1966_p5)
}
  0x1f   : > { %s1970_s7 = scalar_lea.vmem %s141_s22, 1024  ;;  %p1978_p2 = scmp.lt.s32.totalorder %s141_s22, %s141_s22 }
  0x20   : > { %p1971_p7 = scmp.ne.s32.totalorder %s141_s22, %s1970_s7  ;;  %p1979_p6 = scmp.lt.s32.totalorder %s1970_s7, %s1970_s7 }
  0x22   : > { %p1973_p9 = pnand %p1971_p7, %p1959_p12  ;;  %p1980_p4 = por %p1979_p6, %p1978_p2 }
  0x24   : > { %p1974_p1 = pneg %p1973_p9 }
  0x26   : > { %p1981_p8 = pnand %p1980_p4, %p1974_p1 }
  0x28   : > { %1984 = shalt.err (!%p1981_p8)
}
  0x29   : > { %s2120_s8 = smov 64   ;;  %s2121_s9 = smov 4  }
  0x2a   : > { %1863 = dma.hbm_to_vmem [thread:$0]  (!%p2196_p10), %s3093_s1, 1024, %s141_s22, [#allocation6], %s2120_s8, %s2120_s8, %s2121_s9  }
  0x2b   : > { %p29_p1 = scmp.eq.s32.totalorder %s28_s26, 0  ;;  %p38_p2 = scmp.ne.s32.totalorder %s2113_s14, %s2109_s13 }
  0x2c   : > { %p39_p4 = scmp.eq.s32.totalorder %s2117_s15, 0  ;;  %p1876_p6 = scmp.lt.s32.totalorder %s2117_s15, 3 }
  0x2d   : > { %s2230_s17 = scalar_select %p29_p1, %s2113_s14, %s31_s25  }
  0x2e   : > { %p40_p8 = por %p39_p4, %p38_p2  ;;  %p3125_p11 = scmp.eq.s32.totalorder %s2169_s16, 2 }
  0x2f   : > { %s154_s23 = sand.u32 1, %s2113_s14   ;;  %s1460_s27 = sshll.u32 %s2117_s15, 12 }
  0x30   : > { %p2234_p12 = por %p3125_p11, %p38_p2  ;;  %s1395_s28 = sshll.u32 %s154_s23, 8 }
  0x31   : > { %s2243_s4 = scalar_lea.hbm %s3092_s0, %s1460_s27  ;;  %s158_s22 = scalar_lea.vmem [#allocation2], %s1395_s28 }
  0x32   : > { %s165_s25 = sshll.u32 %s158_s22, 4  ;;  %p2245_p10 = pnand %p1876_p6, %p40_p8  ;;  %s2249_s25 = int_to_ptr.vmem [resolvable:$true] %s165_s25 }
  0x33   : > { %s2251_s5 = scalar_lea.sflag [#allocation3], %s154_s23  ;;  %s1985_s6 = scalar_lea.hbm %s2243_s4, 4096 }
  0x34   : > { %p1986_p13 = scmp.ne.s32.totalorder %s2243_s4, %s1985_s6  ;;  %p1987_p0 = pneg %p2245_p10 }
  0x35   : > { %s1990_s11 = scalar_lea.hbm %s3092_s0, 12288  ;;  %p1991_p7 = scmp.lt.u32.totalorder %s2243_s4, %s3092_s0 }
  0x36   : > { %p1988_p3 = pnand %p1987_p0, %p1986_p13  ;;  %p1992_p9 = scmp.lt.u32.totalorder %s1990_s11, %s1985_s6 }
  0x37   : > { %p1994_p2 = scmp.lt.u32.totalorder %s1985_s6, %s2243_s4 }
  0x38   : > { %p1989_p5 = pneg %p1988_p3  ;;  %p1993_p1 = por %p1992_p9, %p1991_p7 }
  0x3a   : > { %p1995_p4 = por %p1994_p2, %p1993_p1 }
  0x3c   : > { %p1996_p6 = pnand %p1995_p4, %p1989_p5 }
  0x3e   : > { %1999 = shalt.err (!%p1996_p6)
}
  0x3f   : > { %s2000_s23 = scalar_lea.vmem %s2249_s25, 4096  ;;  %s2122_s29 = smov [#allocation2]  }
  0x40   : > { %p2001_p8 = scmp.ne.s32.totalorder %s2249_s25, %s2000_s23  ;;  %s2005_s30 = sshll.u32 %s2122_s29, 4  ;;  %s2006_s30 = int_to_ptr.vmem [resolvable:$false] %s2005_s30 }
  0x41   : > { %s2007_s22 = scalar_lea.vmem %s2006_s30, 8192  ;;  %p2008_p3 = scmp.lt.s32.totalorder %s2249_s25, %s2006_s30 }
  0x42   : > { %p2003_p11 = pnand %p2001_p8, %p1987_p0  ;;  %p2009_p7 = scmp.lt.s32.totalorder %s2007_s22, %s2000_s23 }
  0x44   : > { %p2004_p13 = pneg %p2003_p11  ;;  %p2010_p9 = por %p2009_p7, %p2008_p3 }
  0x46   : > { %p2011_p1 = pnand %p2010_p9, %p2004_p13 }
  0x48   : > { %2014 = shalt.err (!%p2011_p1)
}
  0x49   : > { %1867 = dma.hbm_to_vmem [thread:$0]  (!%p2245_p10), %s2243_s4, 4096, %s2249_s25, %s2251_s5, %s2120_s8, %s2120_s8, %s2121_s9  }
  0x4a   : > { %p3128_p0 = scmp.ne.s32.totalorder %s3123_s20, 0 }
  0x4c   : > { %177 = sbr.rel (%p3128_p0) target bundleno = 765 (0x2fd), region = 28 }
  0x53   : > { %s2285_s6 = sand.u32 1, %s2109_s13   ;;  %p3129_p5 = scmp.ne.s32.totalorder %s3121_s18, 0 }
  0x54   : > { %s1399_s7 = sshll.u32 %s2285_s6, 8  ;;  %s180_s10 = scalar_lea.sflag [#allocation3], %s2285_s6 }
  0x55   : > { %s2289_s11 = scalar_lea.vmem [#allocation2], %s1399_s7 }
  0x56   : > { %2088 = dma.done.wait (%p3129_p5), %s180_s10, 4096  }
  0x57   : > { %2090 = vsyncadd (%p3129_p5), %s180_s10, 4294963200  ;;  %p3130_p10 = scmp.eq.s32.totalorder %s2169_s16, 0 }
  0x59   : > { %2092 = dma.done.wait (%p3130_p10), [#allocation6], 1024   ;;  %p3131_p2 = pmov %p3130_p10 }
  0x5a   : > { %v1917_v0 = vld [vmem:[#allocation5] sm:$0xff]   ;;  %v1918_v1 = vld [vmem:[#allocation5 + $0x8] sm:$0xff]   ;;  %v1919_v2 = vld [vmem:[#allocation5 + $0x10] sm:$0xff]   ;;  %v891_v40 = vlaneseq  ;;  %v3099_v42 = vmov 1.0   ;;  %s1401_s18 = sshll.u32 %s2285_s6, 9  ;;  %s1461_s8 = sshll.u32 %s2169_s16, 13 }
  0x5b   : > { %2094 = vsyncadd (%p3131_p2), [#allocation6], 4294966272  ;;  %1642 = vmatprep.subr.bf16.mxu0 %v1917_v0  ;;  %v1920_v3 = vld [vmem:[#allocation5 + $0x18] sm:$0xff]   ;;  %v1925_v4 = vld [vmem:[%s2289_s11] sm:$0xff]   ;;  %s2340_s20 = scalar_lea.vmem [#allocation7], %s1401_s18  ;;  %s3015_s25 = scalar_lea.hbm %s3094_s2, %s1461_s8 }
  0x5c   : > { %1643 = vmatpush3.bf16.msra.mxu0 %v1917_v0  ;;  %1658 = vmatprep.mubr.bf16.mxu0 %v1925_v4  ;;  %v1921_v5 = vld [vmem:[#allocation5 + $0x20] sm:$0xff]   ;;  %v1922_v6 = vld [vmem:[#allocation5 + $0x28] sm:$0xff]   ;;  %v1923_v7 = vld [vmem:[#allocation5 + $0x30] sm:$0xff]   ;;  %v2331_v41 = vshrl.u32 %v891_v40, 7  ;;  %s1263_s26 = sshll.u32 %s2340_s20, 4  ;;  %s1245_s5 = scalar_lea.sflag [#allocation4], %s2285_s6  ;;  %s3018_s26 = int_to_ptr.vmem [resolvable:$true] %s1263_s26 }
  0x5d   : > { %1644 = vmatprep.subr.bf16.mxu0 %v1918_v1  ;;  %v1924_v8 = vld [vmem:[#allocation5 + $0x38] sm:$0xff]   ;;  %v1926_v9 = vld [vmem:[%s2289_s11 + $0x8] sm:$0xff]   ;;  %v1927_v10 = vld [vmem:[%s2289_s11 + $0x10] sm:$0xff]   ;;  %s2015_s27 = scalar_lea.vmem %s3018_s26, 8192  ;;  %s2124_s28 = smov [#allocation7]  }
  0x5e   : > { %v1928_v11 = vld [vmem:[%s2289_s11 + $0x18] sm:$0xff]   ;;  %v1929_v12 = vld [vmem:[%s2289_s11 + $0x20] sm:$0xff]   ;;  %v1930_v13 = vld [vmem:[%s2289_s11 + $0x28] sm:$0xff]   ;;  %vm896_vm0 = vcmp.eq.s32.totalorder %v2331_v41, 1  ;;  %vm893_vm1 = vcmp.eq.s32.totalorder %v2331_v41, 0  ;;  %p2016_p4 = scmp.ne.s32.totalorder %s3018_s26, %s2015_s27  ;;  %s2019_s23 = sshll.u32 %s2124_s28, 4  ;;  %s2020_s23 = int_to_ptr.vmem [resolvable:$false] %s2019_s23 }
  0x5f   : > { %v1931_v14 = vld [vmem:[%s2289_s11 + $0x30] sm:$0xff]   ;;  %v1932_v15 = vld [vmem:[%s2289_s11 + $0x38] sm:$0xff]   ;;  %v1933_v16 = vld [vmem:[%s2289_s11 + $0x40] sm:$0xff]   ;;  %1445 = vmatprep.mubr.msk.f32.mxu1 %vm896_vm0, %v3099_v42  ;;  %s2021_s29 = scalar_lea.vmem %s2020_s23, 16384  ;;  %p2022_p11 = scmp.lt.s32.totalorder %s3018_s26, %s2020_s23 }
  0x60   : > { %1645 = vmatpush3.bf16.msra.mxu0 %v1918_v1  ;;  %v1934_v17 = vld [vmem:[%s2289_s11 + $0x48] sm:$0xff]   ;;  %v1935_v18 = vld [vmem:[%s2289_s11 + $0x50] sm:$0xff]   ;;  %v1936_v19 = vld [vmem:[%s2289_s11 + $0x58] sm:$0xff]   ;;  %p2017_p6 = pnand %p2016_p4, %p2234_p12  ;;  %p2023_p13 = scmp.lt.s32.totalorder %s2021_s29, %s2015_s27 }
  0x61   : > { %1646 = vmatprep.subr.bf16.mxu0 %v1919_v2  ;;  %v1937_v20 = vld [vmem:[%s2289_s11 + $0x60] sm:$0xff]   ;;  %v1938_v21 = vld [vmem:[%s2289_s11 + $0x68] sm:$0xff]   ;;  %v1939_v22 = vld [vmem:[%s2289_s11 + $0x70] sm:$0xff]  }
  0x62   : > { %v1940_v23 = vld [vmem:[%s2289_s11 + $0x78] sm:$0xff]   ;;  %v1941_v24 = vld [vmem:[%s2289_s11 + $0x80] sm:$0xff]   ;;  %v1942_v25 = vld [vmem:[%s2289_s11 + $0x88] sm:$0xff]   ;;  %p2018_p8 = pneg %p2017_p6  ;;  %p2024_p3 = por %p2023_p13, %p2022_p11 }
  0x63   : > { %v1943_v26 = vld [vmem:[%s2289_s11 + $0x90] sm:$0xff]   ;;  %v1944_v27 = vld [vmem:[%s2289_s11 + $0x98] sm:$0xff]   ;;  %v1945_v28 = vld [vmem:[%s2289_s11 + $0xa0] sm:$0xff]  }
  0x64   : > { %1647 = vmatpush3.bf16.msra.mxu0 %v1919_v2  ;;  %v1946_v29 = vld [vmem:[%s2289_s11 + $0xa8] sm:$0xff]   ;;  %v1947_v30 = vld [vmem:[%s2289_s11 + $0xb0] sm:$0xff]   ;;  %v1948_v31 = vld [vmem:[%s2289_s11 + $0xb8] sm:$0xff]   ;;  %p2025_p7 = pnand %p2024_p3, %p2018_p8 }
  0x65   : > { %1648 = vmatprep.subr.bf16.mxu0 %v1920_v3  ;;  %v1949_v32 = vld [vmem:[%s2289_s11 + $0xc0] sm:$0xff]   ;;  %v1950_v33 = vld [vmem:[%s2289_s11 + $0xc8] sm:$0xff]   ;;  %v1951_v34 = vld [vmem:[%s2289_s11 + $0xd0] sm:$0xff]  }
  0x66   : > { %v1952_v35 = vld [vmem:[%s2289_s11 + $0xd8] sm:$0xff]   ;;  %v1953_v36 = vld [vmem:[%s2289_s11 + $0xe0] sm:$0xff]   ;;  %v1954_v37 = vld [vmem:[%s2289_s11 + $0xe8] sm:$0xff]  }
  0x67   : > { %v1955_v38 = vld [vmem:[%s2289_s11 + $0xf0] sm:$0xff]   ;;  %v1956_v39 = vld [vmem:[%s2289_s11 + $0xf8] sm:$0xff]  }
  0x68   : > { %1649 = vmatpush3.bf16.msra.mxu0 %v1920_v3 }
  0x69   : > { %1650 = vmatprep.subr.bf16.mxu0 %v1921_v5 }
  0x6c   : > { %1651 = vmatpush3.bf16.msra.mxu0 %v1921_v5 }
  0x6d   : > { %1652 = vmatprep.subr.bf16.mxu0 %v1922_v6 }
  0x70   : > { %1653 = vmatpush3.bf16.msra.mxu0 %v1922_v6 }
  0x71   : > { %1654 = vmatprep.subr.bf16.mxu0 %v1923_v7 }
  0x74   : > { %1655 = vmatpush3.bf16.msra.mxu0 %v1923_v7 }
  0x75   : > { %1656 = vmatprep.subr.bf16.mxu0 %v1924_v8 }
  0x78   : > { %1657 = vmatpush3.bf16.msra.mxu0 %v1924_v8 }
  0x7b   : > { %1659 = vmatmul.mubr.bf16.vlgmr.msra.gmra.mrb[0].mxu0 %v1926_v9 }
  0x7c   : > { %1662 = vmatprep.mubr.bf16.mxu0 %v1927_v10 }
  0x83   : > { %1663 = vmatmul.mubr.bf16.gmra.mrb[4].mxu0 %v1928_v11 }
  0x84   : > { %1666 = vmatprep.mubr.bf16.mxu0 %v1929_v12 }
  0x8b   : > { %1667 = vmatmul.mubr.bf16.gmra.mrb[8].mxu0 %v1930_v13 }
  0x8c   : > { %1670 = vmatprep.mubr.bf16.mxu0 %v1931_v14 }
  0x93   : > { %1671 = vmatmul.mubr.bf16.gmra.mrb[12].mxu0 %v1932_v15 }
  0x94   : > { %1674 = vmatprep.mubr.bf16.mxu0 %v1933_v16 }
  0x9b   : > { %1675 = vmatmul.mubr.bf16.gmra.mrb[16].mxu0 %v1934_v17 }
  0x9c   : > { %1678 = vmatprep.mubr.bf16.mxu0 %v1935_v18 }
  0xa3   : > { %1679 = vmatmul.mubr.bf16.gmra.mrb[20].mxu0 %v1936_v19 }
  0xa4   : > { %1682 = vmatprep.mubr.bf16.mxu0 %v1937_v20 }
  0xab   : > { %1683 = vmatmul.mubr.bf16.gmra.mrb[24].mxu0 %v1938_v21 }
  0xac   : > { %1686 = vmatprep.mubr.bf16.mxu0 %v1939_v22 }
  0xb3   : > { %1687 = vmatmul.mubr.bf16.gmra.mrb[28].mxu0 %v1940_v23 }
  0xb4   : > { %1690 = vmatprep.mubr.bf16.mxu0 %v1941_v24 }
  0xbb   : > { %1691 = vmatmul.mubr.bf16.gmra.mrb[32].mxu0 %v1942_v25 }
  0xbc   : > { %1694 = vmatprep.mubr.bf16.mxu0 %v1943_v26 }
  0xc3   : > { %1695 = vmatmul.mubr.bf16.gmra.mrb[36].mxu0 %v1944_v27 }
  0xc4   : > { %1698 = vmatprep.mubr.bf16.mxu0 %v1945_v28 }
  0xcb   : > { %1699 = vmatmul.mubr.bf16.gmra.mrb[40].mxu0 %v1946_v29 }
  0xcc   : > { %1702 = vmatprep.mubr.bf16.mxu0 %v1947_v30 }
  0xd3   : > { %1703 = vmatmul.mubr.bf16.gmra.mrb[44].mxu0 %v1948_v31 }
  0xd4   : > { %1706 = vmatprep.mubr.bf16.mxu0 %v1949_v32 }
  0xdb   : > { %1707 = vmatmul.mubr.bf16.gmra.mrb[48].mxu0 %v1950_v33 }
  0xdc   : > { %1710 = vmatprep.mubr.bf16.mxu0 %v1951_v34 }
  0xe3   : > { %1711 = vmatmul.mubr.bf16.gmra.mrb[52].mxu0 %v1952_v35 }
  0xe4   : > { %1714 = vmatprep.mubr.bf16.mxu0 %v1953_v36 }
  0xeb   : > { %1715 = vmatmul.mubr.bf16.gmra.mrb[56].mxu0 %v1954_v37 }
  0xec   : > { %1718 = vmatprep.mubr.bf16.mxu0 %v1955_v38 }
  0xf3   : > { %1719 = vmatmul.mubr.bf16.gmra.mrb[60].mxu0 %v1956_v39 }
 0x14e   : > { %v2338_v43 = vpop.f32.mrb[0].mxu0 }
 0x14f   : > { %829 = vst [vmem:[%s2340_s20 + $0x10] sm:$0xff] %v2338_v43  ;;  %v2344_v44 = vpop.f32.mrb[1].mxu0  ;;  %v2352_v46 = vmul.f32 %v2338_v43, %v2338_v43 }
 0x150   : > { %827 = vst [vmem:[%s2340_s20] sm:$0xff] %v2344_v44  ;;  %v2348_v45 = vpop.f32.mrb[2].mxu0  ;;  %v2370_v51 = vmul.f32 %v2344_v44, %v2344_v44 }
 0x151   : > { %830 = vst [vmem:[%s2340_s20 + $0x18] sm:$0xff] %v2348_v45  ;;  %v2358_v47 = vmul.f32 %v2348_v45, %v2348_v45  ;;  %v2362_v49 = vpop.f32.mrb[3].mxu0 }
 0x152   : > { %828 = vst [vmem:[%s2340_s20 + $0x8] sm:$0xff] %v2362_v49  ;;  %v2374_v52 = vmul.f32 %v2362_v49, %v2362_v49 }
 0x153   : > { %v1728_v53 = vpack.c.bf16 %v2358_v47, %v2352_v46 }
 0x154   : > { %v1724_v54 = vpack.c.bf16 %v2374_v52, %v2370_v51 }
 0x156   : > { %v2380_v55 = vpop.f32.mrb[4].mxu0 }
 0x157   : > { %833 = vst [vmem:[%s2340_s20 + $0x30] sm:$0xff] %v2380_v55  ;;  %v2384_v56 = vpop.f32.mrb[5].mxu0  ;;  %v2392_v58 = vmul.f32 %v2380_v55, %v2380_v55 }
 0x158   : > { %831 = vst [vmem:[%s2340_s20 + $0x20] sm:$0xff] %v2384_v56  ;;  %v2388_v57 = vpop.f32.mrb[6].mxu0  ;;  %v2406_v62 = vmul.f32 %v2384_v56, %v2384_v56 }
 0x159   : > { %834 = vst [vmem:[%s2340_s20 + $0x38] sm:$0xff] %v2388_v57  ;;  %v2398_v59 = vmul.f32 %v2388_v57, %v2388_v57  ;;  %v2402_v61 = vpop.f32.mrb[7].mxu0 }
 0x15a   : > { %832 = vst [vmem:[%s2340_s20 + $0x28] sm:$0xff] %v2402_v61  ;;  %v2412_v63 = vmul.f32 %v2402_v61, %v2402_v61 }
 0x15b   : > { %v1736_v1 = vpack.c.bf16 %v2398_v59, %v2392_v58 }
 0x15c   : > { %v1732_v2 = vpack.c.bf16 %v2412_v63, %v2406_v62 }
 0x15e   : > { %v2420_v3 = vpop.f32.mrb[8].mxu0 }
 0x15f   : > { %837 = vst [vmem:[%s2340_s20 + $0x50] sm:$0xff] %v2420_v3  ;;  %v2424_v4 = vpop.f32.mrb[9].mxu0  ;;  %v2432_v6 = vmul.f32 %v2420_v3, %v2420_v3 }
 0x160   : > { %835 = vst [vmem:[%s2340_s20 + $0x40] sm:$0xff] %v2424_v4  ;;  %v2428_v5 = vpop.f32.mrb[10].mxu0  ;;  %v2446_v10 = vmul.f32 %v2424_v4, %v2424_v4 }
 0x161   : > { %838 = vst [vmem:[%s2340_s20 + $0x58] sm:$0xff] %v2428_v5  ;;  %v2438_v7 = vmul.f32 %v2428_v5, %v2428_v5  ;;  %v2442_v9 = vpop.f32.mrb[11].mxu0 }
 0x162   : > { %836 = vst [vmem:[%s2340_s20 + $0x48] sm:$0xff] %v2442_v9  ;;  %v2452_v11 = vmul.f32 %v2442_v9, %v2442_v9 }
 0x163   : > { %v1744_v13 = vpack.c.bf16 %v2438_v7, %v2432_v6 }
 0x164   : > { %v1740_v14 = vpack.c.bf16 %v2452_v11, %v2446_v10 }
 0x166   : > { %v2460_v15 = vpop.f32.mrb[12].mxu0 }
 0x167   : > { %841 = vst [vmem:[%s2340_s20 + $0x70] sm:$0xff] %v2460_v15  ;;  %v2464_v16 = vpop.f32.mrb[13].mxu0  ;;  %v2472_v18 = vmul.f32 %v2460_v15, %v2460_v15 }
 0x168   : > { %839 = vst [vmem:[%s2340_s20 + $0x60] sm:$0xff] %v2464_v16  ;;  %v2468_v17 = vpop.f32.mrb[14].mxu0  ;;  %v2486_v22 = vmul.f32 %v2464_v16, %v2464_v16 }
 0x169   : > { %842 = vst [vmem:[%s2340_s20 + $0x78] sm:$0xff] %v2468_v17  ;;  %v2478_v19 = vmul.f32 %v2468_v17, %v2468_v17  ;;  %v2482_v21 = vpop.f32.mrb[15].mxu0 }
 0x16a   : > { %840 = vst [vmem:[%s2340_s20 + $0x68] sm:$0xff] %v2482_v21  ;;  %v2492_v23 = vmul.f32 %v2482_v21, %v2482_v21 }
 0x16b   : > { %v1752_v25 = vpack.c.bf16 %v2478_v19, %v2472_v18 }
 0x16c   : > { %v1748_v26 = vpack.c.bf16 %v2492_v23, %v2486_v22 }
 0x16e   : > { %v2500_v27 = vpop.f32.mrb[16].mxu0 }
 0x16f   : > { %845 = vst [vmem:[%s2340_s20 + $0x90] sm:$0xff] %v2500_v27  ;;  %v2504_v28 = vpop.f32.mrb[17].mxu0  ;;  %v917_v30 = vmul.f32 %v2500_v27, %v2500_v27 }
 0x170   : > { %843 = vst [vmem:[%s2340_s20 + $0x80] sm:$0xff] %v2504_v28  ;;  %v2508_v29 = vpop.f32.mrb[18].mxu0  ;;  %v915_v35 = vmul.f32 %v2504_v28, %v2504_v28 }
 0x171   : > { %846 = vst [vmem:[%s2340_s20 + $0x98] sm:$0xff] %v2508_v29  ;;  %v918_v31 = vmul.f32 %v2508_v29, %v2508_v29  ;;  %v2518_v33 = vpop.f32.mrb[19].mxu0 }
 0x172   : > { %844 = vst [vmem:[%s2340_s20 + $0x88] sm:$0xff] %v2518_v33  ;;  %v916_v36 = vmul.f32 %v2518_v33, %v2518_v33 }
 0x173   : > { %v1726_v37 = vpack.c.bf16 %v918_v31, %v917_v30 }
 0x174   : > { %v1722_v38 = vpack.c.bf16 %v916_v36, %v915_v35 }
 0x176   : > { %v2528_v39 = vpop.f32.mrb[20].mxu0  ;;  %1723 = vmatprep.subr.bf16.mxu1 %v1722_v38 }
 0x177   : > { %849 = vst [vmem:[%s2340_s20 + $0xb0] sm:$0xff] %v2528_v39  ;;  %v2532_v40 = vpop.f32.mrb[21].mxu0  ;;  %1725 = vmatpush3.bf16.msra.mxu1 %v1724_v54  ;;  %v921_v30 = vmul.f32 %v2528_v39, %v2528_v39 }
 0x178   : > { %847 = vst [vmem:[%s2340_s20 + $0xa0] sm:$0xff] %v2532_v40  ;;  %v2539_v20 = vpop.f32.mrb[22].mxu0  ;;  %1727 = vmatprep.subr.bf16.mxu1 %v1726_v37  ;;  %v919_v52 = vmul.f32 %v2532_v40, %v2532_v40 }
 0x179   : > { %850 = vst [vmem:[%s2340_s20 + $0xb8] sm:$0xff] %v2539_v20  ;;  %v922_v31 = vmul.f32 %v2539_v20, %v2539_v20  ;;  %v2549_v51 = vpop.f32.mrb[23].mxu0 }
 0x17a   : > { %848 = vst [vmem:[%s2340_s20 + $0xa8] sm:$0xff] %v2549_v51  ;;  %v920_v54 = vmul.f32 %v2549_v51, %v2549_v51 }
 0x17b   : > { %1729 = vmatpush3.bf16.msra.mxu1 %v1728_v53  ;;  %v1734_v37 = vpack.c.bf16 %v922_v31, %v921_v30 }
 0x17c   : > { %v1730_v38 = vpack.c.bf16 %v920_v54, %v919_v52 }
 0x17e   : > { %v2562_v24 = vpop.f32.mrb[24].mxu0  ;;  %1731 = vmatprep.subr.bf16.mxu1 %v1730_v38 }
 0x17f   : > { %853 = vst [vmem:[%s2340_s20 + $0xd0] sm:$0xff] %v2562_v24  ;;  %v2566_v8 = vpop.f32.mrb[25].mxu0  ;;  %1733 = vmatpush3.bf16.msra.mxu1 %v1732_v2  ;;  %v925_v46 = vmul.f32 %v2562_v24, %v2562_v24 }
 0x180   : > { %851 = vst [vmem:[%s2340_s20 + $0xc0] sm:$0xff] %v2566_v8  ;;  %v2573_v12 = vpop.f32.mrb[26].mxu0  ;;  %1735 = vmatprep.subr.bf16.mxu1 %v1734_v37  ;;  %v923_v63 = vmul.f32 %v2566_v8, %v2566_v8 }
 0x181   : > { %854 = vst [vmem:[%s2340_s20 + $0xd8] sm:$0xff] %v2573_v12  ;;  %v926_v47 = vmul.f32 %v2573_v12, %v2573_v12  ;;  %v2583_v62 = vpop.f32.mrb[27].mxu0 }
 0x182   : > { %852 = vst [vmem:[%s2340_s20 + $0xc8] sm:$0xff] %v2583_v62  ;;  %v924_v2 = vmul.f32 %v2583_v62, %v2583_v62 }
 0x183   : > { %1737 = vmatpush3.bf16.msra.mxu1 %v1736_v1  ;;  %v1742_v31 = vpack.c.bf16 %v926_v47, %v925_v46 }
 0x184   : > { %v1738_v52 = vpack.c.bf16 %v924_v2, %v923_v63 }
 0x186   : > { %v2596_v54 = vpop.f32.mrb[28].mxu0  ;;  %1739 = vmatprep.subr.bf16.mxu1 %v1738_v52 }
 0x187   : > { %857 = vst [vmem:[%s2340_s20 + $0xf0] sm:$0xff] %v2596_v54  ;;  %v2600_v37 = vpop.f32.mrb[29].mxu0  ;;  %1741 = vmatpush3.bf16.msra.mxu1 %v1740_v14  ;;  %v929_v58 = vmul.f32 %v2596_v54, %v2596_v54 }
 0x188   : > { %855 = vst [vmem:[%s2340_s20 + $0xe0] sm:$0xff] %v2600_v37  ;;  %v2607_v38 = vpop.f32.mrb[30].mxu0  ;;  %1743 = vmatprep.subr.bf16.mxu1 %v1742_v31  ;;  %v927_v11 = vmul.f32 %v2600_v37, %v2600_v37 }
 0x189   : > { %858 = vst [vmem:[%s2340_s20 + $0xf8] sm:$0xff] %v2607_v38  ;;  %v930_v59 = vmul.f32 %v2607_v38, %v2607_v38  ;;  %v2617_v10 = vpop.f32.mrb[31].mxu0 }
 0x18a   : > { %856 = vst [vmem:[%s2340_s20 + $0xe8] sm:$0xff] %v2617_v10  ;;  %v928_v14 = vmul.f32 %v2617_v10, %v2617_v10 }
 0x18b   : > { %1745 = vmatpush3.bf16.msra.mxu1 %v1744_v13  ;;  %v1750_v47 = vpack.c.bf16 %v930_v59, %v929_v58 }
 0x18c   : > { %v1746_v63 = vpack.c.bf16 %v928_v14, %v927_v11 }
 0x18e   : > { %v2630_v2 = vpop.f32.mrb[32].mxu0  ;;  %1747 = vmatprep.subr.bf16.mxu1 %v1746_v63 }
 0x18f   : > { %3132 = vst [vmem:[#allocation14_spill] sm:$0xff] %v2630_v2  ;;  %861 = vst [vmem:[%s2340_s20 + $0x110] sm:$0xff] %v2630_v2  ;;  %v2634_v31 = vpop.f32.mrb[33].mxu0  ;;  %1749 = vmatpush3.bf16.msra.mxu1 %v1748_v26  ;;  %v2645_v6 = vmul.f32 %v2630_v2, %v2630_v2 }
 0x190   : > { %859 = vst [vmem:[%s2340_s20 + $0x100] sm:$0xff] %v2634_v31  ;;  %v2641_v52 = vpop.f32.mrb[34].mxu0  ;;  %1751 = vmatprep.subr.bf16.mxu1 %v1750_v47  ;;  %v2659_v23 = vmul.f32 %v2634_v31, %v2634_v31 }
 0x191   : > { %3133 = vst [vmem:[#allocation15_spill] sm:$0xff] %v2641_v52  ;;  %862 = vst [vmem:[%s2340_s20 + $0x118] sm:$0xff] %v2641_v52  ;;  %v2651_v7 = vmul.f32 %v2641_v52, %v2641_v52  ;;  %v2655_v22 = vpop.f32.mrb[35].mxu0 }
 0x192   : > { %860 = vst [vmem:[%s2340_s20 + $0x108] sm:$0xff] %v2655_v22  ;;  %v2665_v26 = vmul.f32 %v2655_v22, %v2655_v22 }
 0x193   : > { %1753 = vmatpush3.bf16.msra.mxu1 %v1752_v25 }
 0x196   : > { %v2676_v14 = vpop.f32.mrb[36].mxu0  ;;  %1446 = vmatmul.mubr.msk.f32.vlgmr.msra.gmra.mrb[0].mxu1 %vm896_vm0, %v3099_v42 }
 0x197   : > { %3134 = vst [vmem:[#allocation16_spill] sm:$0xff] %v2676_v14  ;;  %865 = vst [vmem:[%s2340_s20 + $0x130] sm:$0xff] %v2676_v14  ;;  %v2683_v47 = vpop.f32.mrb[37].mxu0  ;;  %1447 = vmatprep.mubr.msk.f32.mxu1 %vm896_vm0, %v3099_v42  ;;  %v2694_v19 = vmul.f32 %v2676_v14, %v2676_v14 }
 0x198   : > { %3135 = vst [vmem:[#allocation17_spill] sm:$0xff] %v2683_v47  ;;  %863 = vst [vmem:[%s2340_s20 + $0x120] sm:$0xff] %v2683_v47  ;;  %v2690_v18 = vpop.f32.mrb[38].mxu0  ;;  %v2708_v58 = vmul.f32 %v2683_v47, %v2683_v47 }
 0x199   : > { %3136 = vst [vmem:[#allocation18_spill] sm:$0xff] %v2690_v18  ;;  %866 = vst [vmem:[%s2340_s20 + $0x138] sm:$0xff] %v2690_v18  ;;  %v2700_v25 = vmul.f32 %v2690_v18, %v2690_v18  ;;  %v2704_v13 = vpop.f32.mrb[39].mxu0 }
 0x19a   : > { %3137 = vst [vmem:[#allocation19_spill] sm:$0xff] %v2704_v13  ;;  %864 = vst [vmem:[%s2340_s20 + $0x128] sm:$0xff] %v2704_v13  ;;  %v2714_v1 = vmul.f32 %v2704_v13, %v2704_v13 }
 0x19e   : > { %v2722_v30 = vpop.f32.mrb[40].mxu0 }
 0x19f   : > { %3138 = vst [vmem:[#allocation20_spill] sm:$0xff] %v2722_v30  ;;  %869 = vst [vmem:[%s2340_s20 + $0x150] sm:$0xff] %v2722_v30  ;;  %v2726_v60 = vpop.f32.mrb[41].mxu0  ;;  %v2734_v46 = vmul.f32 %v2722_v30, %v2722_v30 }
 0x1a0   : > { %3139 = vst [vmem:[#allocation21_spill] sm:$0xff] %v2726_v60  ;;  %867 = vst [vmem:[%s2340_s20 + $0x140] sm:$0xff] %v2726_v60  ;;  %v2730_v35 = vpop.f32.mrb[42].mxu0  ;;  %v2748_v32 = vmul.f32 %v2726_v60, %v2726_v60 }
 0x1a1   : > { %3140 = vst [vmem:[#allocation22_spill] sm:$0xff] %v2730_v35  ;;  %870 = vst [vmem:[%s2340_s20 + $0x158] sm:$0xff] %v2730_v35  ;;  %v2740_v0 = vmul.f32 %v2730_v35, %v2730_v35  ;;  %v2744_v48 = vpop.f32.mrb[43].mxu0 }
 0x1a2   : > { %3141 = vst [vmem:[#allocation23_spill] sm:$0xff] %v2744_v48  ;;  %868 = vst [vmem:[%s2340_s20 + $0x148] sm:$0xff] %v2744_v48  ;;  %v2754_v50 = vmul.f32 %v2744_v48, %v2744_v48 }
 0x1a6   : > { %v2762_v53 = vpop.f32.mrb[44].mxu0 }
 0x1a7   : > { %3142 = vst [vmem:[#allocation24_spill] sm:$0xff] %v2762_v53  ;;  %873 = vst [vmem:[%s2340_s20 + $0x170] sm:$0xff] %v2762_v53  ;;  %v2766_v63 = vpop.f32.mrb[45].mxu0  ;;  %v2774_v42 = vmul.f32 %v2762_v53, %v2762_v53 }
 0x1a8   : > { %3143 = vst [vmem:[#allocation25_spill] sm:$0xff] %v2766_v63  ;;  %871 = vst [vmem:[%s2340_s20 + $0x160] sm:$0xff] %v2766_v63  ;;  %v2770_v59 = vpop.f32.mrb[46].mxu0  ;;  %v2788_v30 = vmul.f32 %v2766_v63, %v2766_v63 }
 0x1a9   : > { %3144 = vst [vmem:[#allocation26_spill] sm:$0xff] %v2770_v59  ;;  %874 = vst [vmem:[%s2340_s20 + $0x178] sm:$0xff] %v2770_v59  ;;  %v2780_v34 = vmul.f32 %v2770_v59, %v2770_v59  ;;  %v2784_v11 = vpop.f32.mrb[47].mxu0 }
 0x1aa   : > { %3145 = vst [vmem:[#allocation27_spill] sm:$0xff] %v2784_v11  ;;  %872 = vst [vmem:[%s2340_s20 + $0x168] sm:$0xff] %v2784_v11  ;;  %v2794_v35 = vmul.f32 %v2784_v11, %v2784_v11 }
 0x1ae   : > { %v2802_v53 = vpop.f32.mrb[48].mxu0 }
 0x1af   : > { %3146 = vst [vmem:[#allocation28_spill] sm:$0xff] %v2802_v53  ;;  %877 = vst [vmem:[%s2340_s20 + $0x190] sm:$0xff] %v2802_v53  ;;  %v2806_v59 = vpop.f32.mrb[49].mxu0  ;;  %v949_v60 = vmul.f32 %v2802_v53, %v2802_v53  ;;  %v3149_v53 = vpack.c.bf16 %v2665_v26, %v2659_v23 }
 0x1b0   : > { %875 = vst [vmem:[%s2340_s20 + $0x180] sm:$0xff] %v2806_v59  ;;  %v2810_v14 = vpop.f32.mrb[50].mxu0  ;;  %v947_v11 = vmul.f32 %v2806_v59, %v2806_v59 }
 0x1b1   : > { %3147 = vst [vmem:[#allocation29_spill] sm:$0xff] %v2810_v14  ;;  %878 = vst [vmem:[%s2340_s20 + $0x198] sm:$0xff] %v2810_v14  ;;  %v950_v48 = vmul.f32 %v2810_v14, %v2810_v14  ;;  %v2820_v63 = vpop.f32.mrb[51].mxu0 }
 0x1b2   : > { %876 = vst [vmem:[%s2340_s20 + $0x188] sm:$0xff] %v2820_v63  ;;  %v948_v18 = vmul.f32 %v2820_v63, %v2820_v63 }
 0x1b3   : > { %v1758_v13 = vpack.c.bf16 %v950_v48, %v949_v60 }
 0x1b4   : > { %v1754_v2 = vpack.c.bf16 %v948_v18, %v947_v11  ;;  %v3151_v11 = vpack.c.bf16 %v2651_v7, %v2645_v6 }
 0x1b6   : > { %v2830_v52 = vpop.f32.mrb[52].mxu0  ;;  %1755 = vmatprep.subr.bf16.mxu1 %v1754_v2 }
 0x1b7   : > { %3148 = vst [vmem:[#allocation30_spill] sm:$0xff] %v2830_v52  ;;  %881 = vst [vmem:[%s2340_s20 + $0x1b0] sm:$0xff] %v2830_v52  ;;  %v2834_v36 = vpop.f32.mrb[53].mxu0  ;;  %1757 = vmatpush3.bf16.msra.mxu1 %v3149_v53  ;;  %v953_v48 = vmul.f32 %v2830_v52, %v2830_v52 }
 0x1b8   : > { %879 = vst [vmem:[%s2340_s20 + $0x1a0] sm:$0xff] %v2834_v36  ;;  %v2841_v14 = vpop.f32.mrb[54].mxu0  ;;  %1759 = vmatprep.subr.bf16.mxu1 %v1758_v13  ;;  %v951_v53 = vmul.f32 %v2834_v36, %v2834_v36 }
 0x1b9   : > { %3150 = vst [vmem:[#allocation31_spill] sm:$0xff] %v2841_v14  ;;  %882 = vst [vmem:[%s2340_s20 + $0x1b8] sm:$0xff] %v2841_v14  ;;  %v954_v60 = vmul.f32 %v2841_v14, %v2841_v14  ;;  %v2851_v23 = vpop.f32.mrb[55].mxu0  ;;  %v3153_v14 = vpack.c.bf16 %v2714_v1, %v2708_v58 }
 0x1ba   : > { %880 = vst [vmem:[%s2340_s20 + $0x1a8] sm:$0xff] %v2851_v23  ;;  %v952_v13 = vmul.f32 %v2851_v23, %v2851_v23 }
 0x1bb   : > { %1761 = vmatpush3.bf16.msra.mxu1 %v3151_v11  ;;  %v1766_v18 = vpack.c.bf16 %v954_v60, %v953_v48  ;;  %v3156_v48 = vpack.c.bf16 %v2754_v50, %v2748_v32  ;;  %v3158_v50 = vpack.c.bf16 %v2794_v35, %v2788_v30  ;;  %v3159_v32 = vpack.c.bf16 %v2780_v34, %v2774_v42 }
 0x1bc   : > { %v1762_v2 = vpack.c.bf16 %v952_v13, %v951_v53  ;;  %v3163_v42 = vpack.c.bf16 %v2508_v29, %v2500_v27  ;;  %v3168_v27 = vpack.c.bf16 %v2388_v57, %v2380_v55  ;;  %v3173_v55 = vpack.c.bf16 %v2617_v10, %v2600_v37  ;;  %v3187_v29 = vld [vmem:[#allocation17_spill] sm:$0xff] }
 0x1bd   : > { %v3174_v57 = vpack.c.bf16 %v2482_v21, %v2464_v16  ;;  %v3182_v16 = vld [vmem:[#allocation15_spill] sm:$0xff]  ;;  %v3185_v21 = vpack.c.bf16 %v2851_v23, %v2834_v36  ;;  %v3196_v37 = vld [vmem:[#allocation21_spill] sm:$0xff] }
 0x1be   : > { %v2864_v47 = vpop.f32.mrb[56].mxu0  ;;  %1763 = vmatprep.subr.bf16.mxu1 %v1762_v2  ;;  %v3155_v2 = vpack.c.bf16 %v2700_v25, %v2694_v19  ;;  %v3204_v23 = vld [vmem:[#allocation27_spill] sm:$0xff] }
 0x1bf   : > { %3152 = vst [vmem:[#allocation32_spill] sm:$0xff] %v2864_v47  ;;  %885 = vst [vmem:[%s2340_s20 + $0x1d0] sm:$0xff] %v2864_v47  ;;  %v2868_v52 = vpop.f32.mrb[57].mxu0  ;;  %1765 = vmatpush3.bf16.msra.mxu1 %v3153_v14  ;;  %v957_v6 = vmul.f32 %v2864_v47, %v2864_v47 }
 0x1c0   : > { %883 = vst [vmem:[%s2340_s20 + $0x1c0] sm:$0xff] %v2868_v52  ;;  %v2875_v26 = vpop.f32.mrb[58].mxu0  ;;  %1767 = vmatprep.subr.bf16.mxu1 %v1766_v18  ;;  %v955_v58 = vmul.f32 %v2868_v52, %v2868_v52 }
 0x1c1   : > { %3154 = vst [vmem:[#allocation33_spill] sm:$0xff] %v2875_v26  ;;  %886 = vst [vmem:[%s2340_s20 + $0x1d8] sm:$0xff] %v2875_v26  ;;  %v958_v7 = vmul.f32 %v2875_v26, %v2875_v26  ;;  %v799_v1 = vpop.f32.mrb[59].mxu0 }
 0x1c2   : > { %884 = vst [vmem:[%s2340_s20 + $0x1c8] sm:$0xff] %v799_v1  ;;  %v956_v14 = vmul.f32 %v799_v1, %v799_v1  ;;  %v1834_v60 = vpack.c.bf16 %v799_v1, %v2868_v52 }
 0x1c3   : > { %1769 = vmatpush3.bf16.msra.mxu1 %v3155_v2  ;;  %v1774_v53 = vpack.c.bf16 %v958_v7, %v957_v6 }
 0x1c4   : > { %v1770_v13 = vpack.c.bf16 %v956_v14, %v955_v58  ;;  %v3157_v58 = vpack.c.bf16 %v2740_v0, %v2734_v46  ;;  %v3161_v0 = vmov 1.0   ;;  %v3162_v46 = vpack.c.bf16 %v2362_v49, %v2344_v44 }
 0x1c5   : > { %v3166_v44 = vpack.c.bf16 %v2402_v61, %v2384_v56  ;;  %v3167_v49 = vpack.c.bf16 %v2539_v20, %v2528_v39  ;;  %v3171_v56 = vpack.c.bf16 %v2573_v12, %v2562_v24  ;;  %v3172_v61 = vpack.c.bf16 %v2428_v5, %v2420_v3  ;;  %v3180_v12 = vld [vmem:[#allocation28_spill] sm:$0xff]  ;;  %v3186_v24 = vld [vmem:[#allocation19_spill] sm:$0xff] }
 0x1c6   : > { %v1720_v11 = vpop.f32.mrb[60].mxu0  ;;  %1771 = vmatprep.subr.bf16.mxu1 %v1770_v13  ;;  %v3177_v3 = vpack.c.bf16 %v2820_v63, %v2806_v59  ;;  %v3178_v5 = vpack.c.bf16 %v2655_v22, %v2634_v31  ;;  %v3188_v34 = vpack.c.bf16 %v3186_v24, %v3187_v29  ;;  %v3189_v39 = vld [vmem:[#allocation31_spill] sm:$0xff]  ;;  %v3199_v10 = vld [vmem:[#allocation32_spill] sm:$0xff]  ;;  %v3201_v22 = vld [vmem:[#allocation22_spill] sm:$0xff] }
 0x1c7   : > { %889 = vst [vmem:[%s2340_s20 + $0x1f0] sm:$0xff] %v1720_v11  ;;  %v812_v18 = vpop.f32.mrb[61].mxu0  ;;  %1773 = vmatpush3.bf16.msra.mxu1 %v3156_v48  ;;  %v961_v26 = vmul.f32 %v1720_v11, %v1720_v11  ;;  %v3202_v59 = vld [vmem:[#allocation20_spill] sm:$0xff] }
 0x1c8   : > { %887 = vst [vmem:[%s2340_s20 + $0x1e0] sm:$0xff] %v812_v18  ;;  %v1721_v47 = vpop.f32.mrb[62].mxu0  ;;  %1775 = vmatprep.subr.bf16.mxu1 %v1774_v53  ;;  %v959_v25 = vmul.f32 %v812_v18, %v812_v18  ;;  %v3198_v36 = vld [vmem:[#allocation33_spill] sm:$0xff]  ;;  %v3203_v63 = vpack.c.bf16 %v3201_v22, %v3202_v59  ;;  %v3208_v53 = vld [vmem:[#allocation24_spill] sm:$0xff] }
 0x1c9   : > { %890 = vst [vmem:[%s2340_s20 + $0x1f8] sm:$0xff] %v1721_v47  ;;  %v962_v52 = vmul.f32 %v1721_v47, %v1721_v47  ;;  %v1846_v1 = vpack.c.bf16 %v1721_v47, %v1720_v11  ;;  %v815_v19 = vpop.f32.mrb[63].mxu0  ;;  %v3160_v47 = vpack.c.bf16 %v2518_v33, %v2504_v28  ;;  %v3164_v28 = vpack.c.bf16 %v2348_v45, %v2338_v43 }
 0x1ca   : > { %888 = vst [vmem:[%s2340_s20 + $0x1e8] sm:$0xff] %v815_v19  ;;  %v960_v6 = vmul.f32 %v815_v19, %v815_v19  ;;  %v1842_v7 = vpack.c.bf16 %v815_v19, %v812_v18  ;;  %v3165_v33 = vpack.c.bf16 %v2549_v51, %v2532_v40  ;;  %v3169_v43 = vpack.c.bf16 %v2583_v62, %v2566_v8  ;;  %v3190_v40 = vld [vmem:[#allocation30_spill] sm:$0xff]  ;;  %v3193_v62 = vld [vmem:[#allocation16_spill] sm:$0xff] }
 0x1cb   : > { %1777 = vmatpush3.bf16.msra.mxu1 %v3157_v58  ;;  %v1782_v14 = vpack.c.bf16 %v962_v52, %v961_v26  ;;  %v3170_v45 = vpack.c.bf16 %v2442_v9, %v2424_v4  ;;  %v3175_v4 = vpack.c.bf16 %v2607_v38, %v2596_v54  ;;  %v3176_v8 = vpack.c.bf16 %v2468_v17, %v2460_v15  ;;  %v3179_v9 = vld [vmem:[#allocation29_spill] sm:$0xff]  ;;  %v3183_v17 = vld [vmem:[#allocation14_spill] sm:$0xff]  ;;  %v3195_v54 = vld [vmem:[#allocation23_spill] sm:$0xff] }
 0x1cc   : > { %v1778_v2 = vpack.c.bf16 %v960_v6, %v959_v25  ;;  %v3181_v15 = vpack.c.bf16 %v3179_v9, %v3180_v12  ;;  %v3184_v20 = vpack.c.bf16 %v3182_v16, %v3183_v17  ;;  %v3191_v35 = vpack.c.bf16 %v3189_v39, %v3190_v40  ;;  %v3192_v51 = vld [vmem:[#allocation18_spill] sm:$0xff]  ;;  %v3205_v26 = vld [vmem:[#allocation25_spill] sm:$0xff] }
 0x1cd   : > { %v3194_v30 = vpack.c.bf16 %v3192_v51, %v3193_v62  ;;  %v3197_v38 = vpack.c.bf16 %v3195_v54, %v3196_v37  ;;  %v3200_v31 = vpack.c.bf16 %v3198_v36, %v3199_v10  ;;  %v3206_v48 = vpack.c.bf16 %v3204_v23, %v3205_v26 }
 0x1ce   : > { %1779 = vmatprep.subr.bf16.mxu1 %v1778_v2 }
 0x1cf   : > { %1781 = vmatpush3.bf16.msra.mxu1 %v3158_v50 }
 0x1d0   : > { %1783 = vmatprep.subr.bf16.mxu1 %v1782_v14 }
 0x1d3   : > { %1785 = vmatpush3.bf16.msra.mxu1 %v3159_v32 }
 0x1d4   : > { %1787 = vmatprep.subr.bf16.mxu1 %v3160_v47 }
 0x1d6   : > { %1448 = vmatmul.mubr.msk.f32.vlgmr.msra.gmra.mrb[2].mxu1 %vm896_vm0, %v3161_v0 }
 0x1d7   : > { %1789 = vmatpush3.bf16.msra.mxu1 %v3162_v46  ;;  %1449 = vmatprep.mubr.msk.f32.mxu1 %vm893_vm1, %v3161_v0 }
 0x1d8   : > { %1791 = vmatprep.subr.bf16.mxu1 %v3163_v42 }
 0x1db   : > { %1793 = vmatpush3.bf16.msra.mxu1 %v3164_v28 }
 0x1dc   : > { %1795 = vmatprep.subr.bf16.mxu1 %v3165_v33 }
 0x1df   : > { %1797 = vmatpush3.bf16.msra.mxu1 %v3166_v44 }
 0x1e0   : > { %1799 = vmatprep.subr.bf16.mxu1 %v3167_v49 }
 0x1e3   : > { %1801 = vmatpush3.bf16.msra.mxu1 %v3168_v27 }
 0x1e4   : > { %1803 = vmatprep.subr.bf16.mxu1 %v3169_v43 }
 0x1e7   : > { %1805 = vmatpush3.bf16.msra.mxu1 %v3170_v45 }
 0x1e8   : > { %1807 = vmatprep.subr.bf16.mxu1 %v3171_v56 }
 0x1eb   : > { %1809 = vmatpush3.bf16.msra.mxu1 %v3172_v61 }
 0x1ec   : > { %1811 = vmatprep.subr.bf16.mxu1 %v3173_v55 }
 0x1ef   : > { %1813 = vmatpush3.bf16.msra.mxu1 %v3174_v57 }
 0x1f0   : > { %1815 = vmatprep.subr.bf16.mxu1 %v3175_v4 }
 0x1f3   : > { %1817 = vmatpush3.bf16.msra.mxu1 %v3176_v8 }
 0x1f4   : > { %1819 = vmatprep.subr.bf16.mxu1 %v3177_v3 }
 0x1f6   : > { %1450 = vmatmul.mubr.msk.f32.vlgmr.msra.gmra.mrb[4].mxu1 %vm893_vm1, %v3161_v0 }
 0x1f7   : > { %1821 = vmatpush3.bf16.msra.mxu1 %v3178_v5  ;;  %1451 = vmatprep.mubr.msk.f32.mxu1 %vm893_vm1, %v3161_v0 }
 0x1f8   : > { %1823 = vmatprep.subr.bf16.mxu1 %v3181_v15 }
 0x1fb   : > { %1825 = vmatpush3.bf16.msra.mxu1 %v3184_v20 }
 0x1fc   : > { %1827 = vmatprep.subr.bf16.mxu1 %v3185_v21 }
 0x1ff   : > { %1829 = vmatpush3.bf16.msra.mxu1 %v3188_v34 }
 0x200   : > { %1831 = vmatprep.subr.bf16.mxu1 %v3191_v35 }
 0x203   : > { %1833 = vmatpush3.bf16.msra.mxu1 %v3194_v30 }
 0x204   : > { %1835 = vmatprep.subr.bf16.mxu1 %v1834_v60  ;;  %v3207_v60 = vld [vmem:[#allocation26_spill] sm:$0xff] }
 0x205   : > { %v3209_v13 = vpack.c.bf16 %v3207_v60, %v3208_v53 }
 0x207   : > { %1837 = vmatpush3.bf16.msra.mxu1 %v3197_v38 }
 0x208   : > { %1839 = vmatprep.subr.bf16.mxu1 %v3200_v31 }
 0x20b   : > { %1841 = vmatpush3.bf16.msra.mxu1 %v3203_v63 }
 0x20c   : > { %1843 = vmatprep.subr.bf16.mxu1 %v1842_v7 }
 0x20f   : > { %1845 = vmatpush3.bf16.msra.mxu1 %v3206_v48 }
 0x210   : > { %1847 = vmatprep.subr.bf16.mxu1 %v1846_v1 }
 0x213   : > { %1849 = vmatpush3.bf16.msra.mxu1 %v3209_v13 }
 0x216   : > { %1452 = vmatmul.mubr.msk.f32.vlgmr.msra.gmra.mrb[6].mxu1 %vm893_vm1, %v3161_v0 }
 0x269   : > { %v1534_v11 = vpop.f32.mrb[0].mxu1 }
 0x26a   : > { %v1535_v18 = vpop.f32.mrb[1].mxu1 }
 0x26b   : > { %v1536_v52 = vadd.f32 %v1535_v18, %v1534_v11 }
 0x26c   : > { %2028 = shalt.err (!%p2025_p7)
}
 0x26d   : > { %s2029_s30 = scalar_lea.hbm %s3015_s25, 8192  ;;  %s2033_s10 = scalar_lea.hbm %s3094_s2, 24576 }
 0x26e   : > { %p2030_p9 = scmp.ne.s32.totalorder %s3015_s25, %s2029_s30  ;;  %p2034_p5 = scmp.lt.u32.totalorder %s3015_s25, %s3094_s2 }
 0x26f   : > { %p2035_p10 = scmp.lt.u32.totalorder %s2033_s10, %s2029_s30  ;;  %p2037_p4 = scmp.lt.u32.totalorder %s2029_s30, %s3015_s25 }
 0x270   : > { %p2031_p1 = pnand %p2030_p9, %p2234_p12 }
 0x271   : > { %p2036_p2 = por %p2035_p10, %p2034_p5 }
 0x272   : > { %p2032_p0 = pneg %p2031_p1 }
 0x273   : > { %p2038_p6 = por %p2037_p4, %p2036_p2 }
 0x275   : > { %p2039_p8 = pnand %p2038_p6, %p2032_p0 }
 0x277   : > { %2042 = shalt.err (!%p2039_p8)
}
 0x278   : > { %s2125_s20 = smov 128   ;;  %s2126_s8 = smov 8  }
 0x279   : > { %1856 = dma.vmem_to_hbm [thread:$0]  (%p2234_p12), %s3018_s26, 8192, %s3015_s25, %s1245_s5, %s2125_s20, %s2125_s20, %s2126_s8  }
 0x27a   : > { %s1402_s9 = sshll.u32 %s2285_s6, 3  ;;  %s1457_s4 = sshll.u32 %s2169_s16, 7 }
 0x27b   : > { %s214_s27 = scalar_lea.vmem [#allocation8], %s1402_s9  ;;  %s3049_s26 = scalar_lea.hbm %s3095_s3, %s1457_s4 }
 0x27c   : > { %s1279_s28 = sshll.u32 %s214_s27, 4  ;;  %s1250_s5 = scalar_lea.sflag [#allocation9], %s2285_s6  ;;  %s3051_s28 = int_to_ptr.vmem [resolvable:$true] %s1279_s28 }
 0x27d   : > { %s2043_s29 = scalar_lea.vmem %s3051_s28, 128  ;;  %s2127_s16 = smov [#allocation8]  }
 0x27e   : > { %p2044_p11 = scmp.ne.s32.totalorder %s3051_s28, %s2043_s29  ;;  %s2047_s30 = sshll.u32 %s2127_s16, 4  ;;  %s2048_s30 = int_to_ptr.vmem [resolvable:$false] %s2047_s30 }
 0x27f   : > { %s2049_s22 = scalar_lea.vmem %s2048_s30, 256  ;;  %p2050_p7 = scmp.lt.s32.totalorder %s3051_s28, %s2048_s30 }
 0x280   : > { %p2045_p13 = pnand %p2044_p11, %p2234_p12  ;;  %p2051_p9 = scmp.lt.s32.totalorder %s2049_s22, %s2043_s29 }
 0x282   : > { %p2046_p3 = pneg %p2045_p13  ;;  %p2052_p1 = por %p2051_p9, %p2050_p7 }
 0x284   : > { %p2053_p0 = pnand %p2052_p1, %p2046_p3 }
 0x2a9   : > { %v1569_v41 = vpop.f32.mrb[2].mxu1 }
 0x2aa   : > { %v1570_v1 = vpop.f32.mrb[3].mxu1 }
 0x2ab   : > { %v1571_v19 = vadd.f32 %v1570_v1, %v1569_v41 }
 0x2ad   : > { %v1100_v25 = vadd.f32 %v1571_v19, %v1536_v52 }
 0x2c9   : > { %v1604_v6 = vpop.f32.mrb[4].mxu1 }
 0x2ca   : > { %v1605_v7 = vpop.f32.mrb[5].mxu1 }
 0x2cb   : > { %v1606_v58 = vadd.f32 %v1605_v7, %v1604_v6 }
 0x2cd   : > { %v1170_v14 = vadd.f32 %v1606_v58, %v1100_v25 }
 0x2e9   : > { %v1639_v2 = vpop.f32.mrb[6].mxu1 }
 0x2ea   : > { %v1640_v50 = vpop.f32.mrb[7].mxu1 }
 0x2eb   : > { %v1641_v32 = vadd.f32 %v1640_v50, %v1639_v2 }
 0x2ed   : > { %v1240_v47 = vadd.f32 %v1641_v32, %v1170_v14 }
 0x2ef   : > { %1243 = vst [vmem:[%s214_s27] sm:$0xff] %v1240_v47 }
 0x2f0   : > { %2056 = shalt.err (!%p2053_p0)
}
 0x2f1   : > { %s2057_s6 = scalar_lea.hbm %s3049_s26, 128  ;;  %s2061_s11 = scalar_lea.hbm %s3095_s3, 384 }
 0x2f2   : > { %p2058_p5 = scmp.ne.s32.totalorder %s3049_s26, %s2057_s6  ;;  %p2062_p4 = scmp.lt.u32.totalorder %s3049_s26, %s3095_s3 }
 0x2f3   : > { %p2063_p6 = scmp.lt.u32.totalorder %s2061_s11, %s2057_s6  ;;  %p2065_p11 = scmp.lt.u32.totalorder %s2057_s6, %s3049_s26 }
 0x2f4   : > { %p2059_p10 = pnand %p2058_p5, %p2234_p12 }
 0x2f5   : > { %p2064_p8 = por %p2063_p6, %p2062_p4 }
 0x2f6   : > { %p2060_p2 = pneg %p2059_p10 }
 0x2f7   : > { %p2066_p13 = por %p2065_p11, %p2064_p8 }
 0x2f9   : > { %p2067_p3 = pnand %p2066_p13, %p2060_p2 }
 0x2fb   : > { %2070 = shalt.err (!%p2067_p3)
}
 0x2fc   : > { %1857 = dma.vmem_to_hbm [thread:$0]  (%p2234_p12), %s3051_s28, 128, %s3049_s26, %s1250_s5  }
 0x2fd PF: > { %p1878_p7 = scmp.ge.s32.totalorder %s2117_s15, 2  ;;  %s1291_s8 = sand.u32 1, %s2105_s12  }
 0x2fe   : > { %p3210_p9 = scmp.ne.s32.totalorder %s3122_s19, 0  ;;  %s1292_s9 = scalar_lea.sflag [#allocation4], %s1291_s8 }
 0x300   : > { %p1869_p1 = pnand %p1878_p7, %p3210_p9 }
 0x302   : > { %2096 = dma.done.wait (!%p1869_p1), %s1292_s9, 8192  }
 0x303   : > { %2098 = vsyncadd (!%p1869_p1), %s1292_s9, 4294959104  ;;  %s1301_s4 = scalar_lea.sflag [#allocation9], %s1291_s8 }
 0x304   : > { %2100 = dma.done.wait (!%p1869_p1), %s1301_s4, 128  }
 0x305   : > { %2102 = vsyncadd (!%p1869_p1), %s1301_s4, 4294967168  ;;  %p21_p12 = scmp.ge.s32.totalorder %s2201_s24, 5   ;;  %s3211_s12 = smov %s2109_s13 }
 0x306   : > { %s3212_s13 = smov %s2113_s14  ;;  %s3213_s14 = smov %s2230_s17 }
 0x307   : > { %s3214_s15 = smov %s2201_s24  ;;  %23 = sbr.rel (!%p21_p12) target bundleno = 8 (0x8), region = 94 }
 0x30e   :  { %1306 = vsyncpa [#allocation3], 1 }
 0x30f   :  { %1308 = vsyncpa [#allocation3 + $0x1], 1 }
 0x310   :  { %1309 = vsyncpa [#allocation6], 1 }
 0x311   :  { %1310 = vsyncpa [#allocation4], 1 }
 0x312   :  { %1312 = vsyncpa [#allocation4 + $0x1], 1 }
 0x313   :  { %1313 = vsyncpa [#allocation9], 1 }
 0x314   :  { %1315 = vsyncpa [#allocation9 + $0x1], 1 }

</bundles_post_ra>
